<compile_context>
chip_gen: v6e
topology: v6e:2x2x1
jax: 0.10.0
libtpu: 0.0.40
codegen_flags: <defaults>
</compile_context>

<pallas_src>
import math

import jax
import jax.numpy as jnp
from jax.experimental import pallas as pl
from jax.experimental.pallas import tpu as pltpu


# ---------------------------------------------------------------------------
# Kernels
# ---------------------------------------------------------------------------
def _packed_kernel(h_ref, mem_ref, ts_ref, sel_ref, w_ref, b1_ref, o_ref):
    """Lane-dense path: one VMEM row packs rpp = 128 // D logical rows.

    h_ref  : [blk, 128]   row-major view of [blk*rpp, D] features
    mem_ref: [blk, rpp]   memory timestamps of the packed logical rows
    ts_ref : [blk, rpp]   event timestamps
    sel_ref: [rpp, 128]   bf16 0/1 block-diagonal selection: sel[j,l] = (l//D == j)
    w_ref  : [1, 128]     Linear(1, D).weight tiled rpp times (f32)
    b1_ref : [1, 128]     (1 + bias) tiled rpp times (f32)
    """
    mem = mem_ref[...]
    ts = ts_ref[...]
    # Matches torch exactly (inf/nan if ts == -1, same as the reference).
    td = (ts - mem) / (ts + 1.0)                       # [blk, rpp] f32

    # Expand td across lanes (lane l <- td[:, l // D]) on the MXU instead of an
    # rpp-step compare/select loop on the VPU.  Split td into three exact bf16
    # terms so each bf16 matmul against the exact 0/1 selection matrix is
    # exact; the f32 sum reconstructs td to ~1 ulp regardless of matmul
    # emulation precision.  MXU extended slot is otherwise idle here.
    sel = sel_ref[...]
    a = td.astype(jnp.bfloat16)
    r1 = td - a.astype(jnp.float32)
    b = r1.astype(jnp.bfloat16)
    r2 = r1 - b.astype(jnp.float32)
    c = r2.astype(jnp.bfloat16)
    td_full = (jnp.dot(a, sel, preferred_element_type=jnp.float32)
               + jnp.dot(b, sel, preferred_element_type=jnp.float32)
               + jnp.dot(c, sel, preferred_element_type=jnp.float32))  # [blk,128]

    hv = h_ref[...]
    scale = td_full * w_ref[...] + b1_ref[...]         # 1 + (td * w + bias), f32
    o_ref[...] = (hv * scale.astype(hv.dtype)).astype(o_ref.dtype)


def _rowwise_kernel(h_ref, mem_ref, ts_ref, w_ref, b1_ref, o_ref):
    """Generic path (D >= 128, D not dividing 128, or the < rpp tail rows).

    The [blk,1] -> [blk,D] broadcast of td stays on the VPU/XLU so the result
    is exact f32; its volume is tiny next to the h / out HBM traffic.
    """
    ts = ts_ref[...]                                    # [blk, 1]
    td = (ts - mem_ref[...]) / (ts + 1.0)               # [blk, 1]
    scale = td * w_ref[...] + b1_ref[...]               # [blk, D]
    hv = h_ref[...]
    o_ref[...] = (hv * scale.astype(hv.dtype)).astype(o_ref.dtype)


# ---------------------------------------------------------------------------
# Block sizing / compiler params
# ---------------------------------------------------------------------------
def _round_up(x, m):
    return ((x + m - 1) // m) * m


def _pick_block_rows(n_rows, row_bytes, target_block_bytes=2 << 20, max_rows=8192):
    """Rows (of the already lane-dense arrays) per grid step.

    * multiple of 32 (f32/bf16/int8 sublane tiles) unless it covers all rows,
    * ~target_block_bytes of h per block (measured mem-bound kernels sit at
      the HBM roofline with ~2-4 MiB tiles; 0.35 us/step overhead amortised),
    * an even number of grid steps whenever there is enough work so the
      "parallel" grid axis shards evenly across v7x's 2 TensorCores.
    """
    if n_rows <= 64:
        return n_rows                                   # single full block
    nominal = max(32, min(max_rows, target_block_bytes // max(row_bytes, 1)))
    nominal = max(32, (nominal // 32) * 32)
    steps = pl.cdiv(n_rows, nominal)
    if n_rows >= 128:
        steps = max(steps, 2)                           # use both v7x cores
    if steps > 1 and steps % 2:
        steps += 1                                      # balanced even split
    blk = _round_up(pl.cdiv(n_rows, steps), 32)
    return min(blk, n_rows)


_COMPILER_PARAMS = pltpu.CompilerParams(
    dimension_semantics=("parallel",),
    # Raises v5e's 16 MiB scoped default; <= physical on v5e/v6e/v7x.
    vmem_limit_bytes=32 * 1024 * 1024,
)


# ---------------------------------------------------------------------------
# pallas_call wrappers
# ---------------------------------------------------------------------------
def _call_packed(h2, mem2, ts2, sel, w_tiled, b1_tiled, out_dtype):
    n_rows = h2.shape[0]
    rpp = mem2.shape[1]
    blk = _pick_block_rows(n_rows, row_bytes=128 * 4)
    grid = (pl.cdiv(n_rows, blk),)
    itemsize = jnp.dtype(out_dtype).itemsize
    cost = pl.CostEstimate(
        flops=n_rows * 128 * (6 * rpp + 4),
        transcendentals=0,
        bytes_accessed=2 * n_rows * 128 * itemsize + 8 * n_rows * rpp + 512 * rpp,
    )
    return pl.pallas_call(
        _packed_kernel,
        out_shape=jax.ShapeDtypeStruct((n_rows, 128), out_dtype),
        grid_spec=pltpu.PrefetchScalarGridSpec(
            num_scalar_prefetch=0,
            grid=grid,
            in_specs=[
                pl.BlockSpec((blk, 128), lambda i: (i, 0)),           # h (lane-dense)
                pl.BlockSpec((blk, rpp), lambda i: (i, 0)),           # mem_ts
                pl.BlockSpec((blk, rpp), lambda i: (i, 0)),           # ts
                pl.BlockSpec((sel.shape[0], 128), lambda i: (0, 0)),  # 0/1 selection
                pl.BlockSpec((1, 128), lambda i: (0, 0)),             # tiled weight
                pl.BlockSpec((1, 128), lambda i: (0, 0)),             # tiled (1+bias)
            ],
            out_specs=pl.BlockSpec((blk, 128), lambda i: (i, 0)),     # lane-dense out
        ),
        compiler_params=_COMPILER_PARAMS,
        cost_estimate=cost,
    )(h2, mem2, ts2, sel, w_tiled, b1_tiled)


def _call_rowwise(h, mem, ts, w_row, b1_row):
    n, d = h.shape
    blk = _pick_block_rows(n, row_bytes=d * 4)
    grid = (pl.cdiv(n, blk),)
    itemsize = jnp.dtype(h.dtype).itemsize
    cost = pl.CostEstimate(
        flops=6 * n * d,
        transcendentals=0,
        bytes_accessed=2 * n * d * itemsize + 8 * n + 8 * d,
    )
    return pl.pallas_call(
        _rowwise_kernel,
        out_shape=jax.ShapeDtypeStruct((n, d), h.dtype),
        grid_spec=pltpu.PrefetchScalarGridSpec(
            num_scalar_prefetch=0,
            grid=grid,
            in_specs=[
                pl.BlockSpec((blk, d), lambda i: (i, 0)),   # h
                pl.BlockSpec((blk, 1), lambda i: (i, 0)),   # mem_ts
                pl.BlockSpec((blk, 1), lambda i: (i, 0)),   # ts
                pl.BlockSpec((1, d), lambda i: (0, 0)),     # weight row
                pl.BlockSpec((1, d), lambda i: (0, 0)),     # (1 + bias) row
            ],
            out_specs=pl.BlockSpec((blk, d), lambda i: (i, 0)),
        ),
        compiler_params=_COMPILER_PARAMS,
        cost_estimate=cost,
    )(h, mem.reshape(n, 1), ts.reshape(n, 1), w_row, b1_row)


def jodie_time_embedding(h, mem_ts, ts, weight, bias):
    """h: [N, D]; mem_ts/ts: [N]; weight: [D, 1] (torch Linear(1, D)); bias: [D]."""
    N, D = h.shape
    mem_ts = mem_ts.reshape(N).astype(jnp.float32)
    ts = ts.reshape(N).astype(jnp.float32)
    w_row = weight.reshape(1, D).astype(jnp.float32)
    b1_row = 1.0 + bias.reshape(1, D).astype(jnp.float32)   # folds the "1 +" in

    lane_dense = (D < 128) and (128 % D == 0)
    if not lane_dense:
        # D >= 128 is already lane-dense row-wise.  D not dividing 128 keeps
        # masked stores on the last lane tile; padding the feature dim would
        # cost a full extra HBM pass of h, which this mem-bound kernel cannot
        # win back.  TODO(synk): revisit if such feature sizes matter.
        return _call_rowwise(h, mem_ts, ts, w_row, b1_row)

    rpp = 128 // D                       # logical rows packed per 128-lane row
    n_main = (N // rpp) * rpp

    if n_main == 0:
        return _call_rowwise(h, mem_ts, ts, w_row, b1_row)

    # Small constants for the packed kernel (built once per call, tiny).
    lane = jnp.arange(128)
    sel = (lane[None, :] // D == jnp.arange(rpp)[:, None]).astype(jnp.bfloat16)
    w_tiled = jnp.tile(w_row, (1, rpp))                    # [1, 128]
    b1_tiled = jnp.tile(b1_row, (1, rpp))                  # [1, 128]

    h_main = h if n_main == N else h[:n_main]
    n_rows = n_main // rpp
    out_main = _call_packed(
        h_main.reshape(n_rows, 128),                       # pure row-major view
        mem_ts[:n_main].reshape(n_rows, rpp),
        ts[:n_main].reshape(n_rows, rpp),
        sel, w_tiled, b1_tiled, h.dtype,
    ).reshape(n_main, D)

    if n_main == N:
        return out_main

    # < rpp leftover rows: handled row-wise (microseconds) instead of padding
    # the whole h array (which would add a full extra HBM read+write pass).
    out_tail = _call_rowwise(h[n_main:], mem_ts[n_main:], ts[n_main:], w_row, b1_row)
    return jnp.concatenate([out_main, out_tail], axis=0)


# ---------------------------------------------------------------------------
# Self-test
# ---------------------------------------------------------------------------
def _reference(h, mem_ts, ts, weight, bias):
    td = ((ts - mem_ts) / (ts + 1.0))[:, None]
    return h * (1.0 + td @ weight.T + bias)


if __name__ == "__main__":
    key = jax.random.PRNGKey(0)

    def make_case(case_key, n, d):
        k_h, k_m, k_dt, k_w, k_b = jax.random.split(case_key, 5)
        h = jax.random.normal(k_h, (n, d), dtype=jnp.float32)
        mem_ts = jax.random.uniform(k_m, (n,), dtype=jnp.float32) * 10.0
        ts = mem_ts + jax.random.uniform(k_dt, (n,), dtype=jnp.float32) * 5.0
        stdv = 1.0 / math.sqrt(1)   # NormalLinear(1, d): stdv = 1/sqrt(in_features)
        weight = jax.random.normal(k_w, (d, 1), dtype=jnp.float32) * stdv
        bias = jax.random.normal(k_b, (d,), dtype=jnp.float32) * stdv
        return h, mem_ts, ts, weight, bias

    cases = [
        (256, 32),   # packed lane-dense path (rpp = 4), aligned N
        (37, 32),    # packed path + row-wise tail (N % rpp != 0)
        (200, 8),    # packed path with rpp = 16
        (16, 256),   # generic row-wise path (D multiple of 128)
    ]
    keys = jax.random.split(key, len(cases))
    for case_key, (n, d) in zip(keys, cases):
        h, mem_ts, ts, weight, bias = make_case(case_key, n, d)
        out = jax.block_until_ready(jodie_time_embedding(h, mem_ts, ts, weight, bias))
        ref = _reference(h, mem_ts, ts, weight, bias)
        assert out.shape == ref.shape, (out.shape, ref.shape)
        assert jnp.allclose(out, ref, atol=1e-5, rtol=1e-5), f"mismatch at {(n, d)}"

    print("KERNEL_OK")
</pallas_src>

<mosaic_0001>
module attributes {stable_mosaic.version = 11 : i64} {
  func.func @_packed_kernel(%arg0: i32, %arg1: memref<64x128xf32, #tpu.memory_space<vmem>>, %arg2: memref<64x4xf32, #tpu.memory_space<vmem>>, %arg3: memref<64x4xf32, #tpu.memory_space<vmem>>, %arg4: memref<4x128xbf16, #tpu.memory_space<vmem>>, %arg5: memref<1x128xf32, #tpu.memory_space<vmem>>, %arg6: memref<1x128xf32, #tpu.memory_space<vmem>>, %arg7: memref<64x128xf32, #tpu.memory_space<vmem>>) attributes {dimension_semantics = [#tpu.dimension_semantics<parallel>], iteration_bounds = array<i64: 1>, scalar_prefetch = 0 : i64, scratch_operands = 0 : i64, tpu.core_type = #tpu.core_type<tc>, window_params = [{transform_indices = @transform_0, window_bounds = array<i64: 64, 128>}, {transform_indices = @transform_1, window_bounds = array<i64: 64, 4>}, {transform_indices = @transform_2, window_bounds = array<i64: 64, 4>}, {pipeline_mode = #tpu.pipeline_mode<synchronous>, transform_indices = @transform_3, window_bounds = array<i64: 4, 128>}, {pipeline_mode = #tpu.pipeline_mode<synchronous>, transform_indices = @transform_4, window_bounds = array<i64: 1, 128>}, {pipeline_mode = #tpu.pipeline_mode<synchronous>, transform_indices = @transform_5, window_bounds = array<i64: 1, 128>}, {transform_indices = @transform_6, window_bounds = array<i64: 64, 128>}]} {
    %c0 = arith.constant 0 : index
    %c0_0 = arith.constant 0 : index
    %0 = vector.load %arg2[%c0, %c0_0] : memref<64x4xf32, #tpu.memory_space<vmem>>, vector<64x4xf32>
    %c0_1 = arith.constant 0 : index
    %c0_2 = arith.constant 0 : index
    %1 = vector.load %arg3[%c0_1, %c0_2] : memref<64x4xf32, #tpu.memory_space<vmem>>, vector<64x4xf32>
    %2 = arith.subf %1, %0 : vector<64x4xf32>
    %cst = arith.constant 1.000000e+00 : f32
    %3 = vector.broadcast %cst : f32 to vector<64x4xf32>
    %4 = arith.addf %1, %3 : vector<64x4xf32>
    %5 = arith.divf %2, %4 : vector<64x4xf32>
    %c0_3 = arith.constant 0 : index
    %c0_4 = arith.constant 0 : index
    %6 = vector.load %arg4[%c0_3, %c0_4] : memref<4x128xbf16, #tpu.memory_space<vmem>>, vector<4x128xbf16>
    %7 = arith.truncf %5 : vector<64x4xf32> to vector<64x4xbf16>
    %8 = arith.extf %7 : vector<64x4xbf16> to vector<64x4xf32>
    %9 = arith.subf %5, %8 : vector<64x4xf32>
    %10 = arith.truncf %9 : vector<64x4xf32> to vector<64x4xbf16>
    %11 = arith.extf %10 : vector<64x4xbf16> to vector<64x4xf32>
    %12 = arith.subf %9, %11 : vector<64x4xf32>
    %13 = arith.truncf %12 : vector<64x4xf32> to vector<64x4xbf16>
    %cst_5 = arith.constant dense<0.000000e+00> : vector<64x128xf32>
    %14 = tpu.matmul %7, %6, %cst_5 {dimension_numbers = #tpu.dot_dimension_numbers<[1], [0], [0], [1], [0, 0, 1, 1], [], []>} : vector<64x4xbf16>, vector<4x128xbf16>, vector<64x128xf32> -> vector<64x128xf32>
    %cst_6 = arith.constant dense<0.000000e+00> : vector<64x128xf32>
    %15 = tpu.matmul %10, %6, %cst_6 {dimension_numbers = #tpu.dot_dimension_numbers<[1], [0], [0], [1], [0, 0, 1, 1], [], []>} : vector<64x4xbf16>, vector<4x128xbf16>, vector<64x128xf32> -> vector<64x128xf32>
    %16 = arith.addf %14, %15 : vector<64x128xf32>
    %cst_7 = arith.constant dense<0.000000e+00> : vector<64x128xf32>
    %17 = tpu.matmul %13, %6, %cst_7 {dimension_numbers = #tpu.dot_dimension_numbers<[1], [0], [0], [1], [0, 0, 1, 1], [], []>} : vector<64x4xbf16>, vector<4x128xbf16>, vector<64x128xf32> -> vector<64x128xf32>
    %18 = arith.addf %16, %17 : vector<64x128xf32>
    %c0_8 = arith.constant 0 : index
    %c0_9 = arith.constant 0 : index
    %19 = vector.load %arg1[%c0_8, %c0_9] : memref<64x128xf32, #tpu.memory_space<vmem>>, vector<64x128xf32>
    %c0_10 = arith.constant 0 : index
    %c0_11 = arith.constant 0 : index
    %20 = vector.load %arg5[%c0_10, %c0_11] : memref<1x128xf32, #tpu.memory_space<vmem>>, vector<1x128xf32>
    %21 = vector.broadcast %20 : vector<1x128xf32> to vector<64x128xf32>
    %22 = arith.mulf %18, %21 : vector<64x128xf32>
    %c0_12 = arith.constant 0 : index
    %c0_13 = arith.constant 0 : index
    %23 = vector.load %arg6[%c0_12, %c0_13] : memref<1x128xf32, #tpu.memory_space<vmem>>, vector<1x128xf32>
    %24 = vector.broadcast %23 : vector<1x128xf32> to vector<64x128xf32>
    %25 = arith.addf %22, %24 : vector<64x128xf32>
    %26 = arith.mulf %19, %25 : vector<64x128xf32>
    %c0_14 = arith.constant 0 : index
    %c0_15 = arith.constant 0 : index
    %27 = vector.load %arg7[%c0_14, %c0_15] : memref<64x128xf32, #tpu.memory_space<vmem>>, vector<64x128xf32>
    tpu.vector_store %arg7[%c0_14, %c0_15], %26 {strides = array<i32>} : memref<64x128xf32, #tpu.memory_space<vmem>>, vector<64x128xf32>,
    return
  }
  func.func @transform_0(%arg0: i32) -> (i32, i32) {
    %c0_i32 = arith.constant 0 : i32
    %c0_i32_0 = arith.constant 0 : i32
    return %arg0, %c0_i32 : i32, i32
  }
  func.func @transform_1(%arg0: i32) -> (i32, i32) {
    %c0_i32 = arith.constant 0 : i32
    %c0_i32_0 = arith.constant 0 : i32
    return %arg0, %c0_i32 : i32, i32
  }
  func.func @transform_2(%arg0: i32) -> (i32, i32) {
    %c0_i32 = arith.constant 0 : i32
    %c0_i32_0 = arith.constant 0 : i32
    return %arg0, %c0_i32 : i32, i32
  }
  func.func @transform_3(%arg0: i32) -> (i32, i32) {
    %c0_i32 = arith.constant 0 : i32
    %c0_i32_0 = arith.constant 0 : i32
    %c0_i32_1 = arith.constant 0 : i32
    return %c0_i32, %c0_i32_0 : i32, i32
  }
  func.func @transform_4(%arg0: i32) -> (i32, i32) {
    %c0_i32 = arith.constant 0 : i32
    %c0_i32_0 = arith.constant 0 : i32
    %c0_i32_1 = arith.constant 0 : i32
    return %c0_i32, %c0_i32_0 : i32, i32
  }
  func.func @transform_5(%arg0: i32) -> (i32, i32) {
    %c0_i32 = arith.constant 0 : i32
    %c0_i32_0 = arith.constant 0 : i32
    %c0_i32_1 = arith.constant 0 : i32
    return %c0_i32, %c0_i32_0 : i32, i32
  }
  func.func @transform_6(%arg0: i32) -> (i32, i32) {
    %c0_i32 = arith.constant 0 : i32
    %c0_i32_0 = arith.constant 0 : i32
    return %arg0, %c0_i32 : i32, i32
  }
}

</mosaic_0001>

<bundles_post_ra>
// kernel: tpu_custom_call.1
= control target key start
LH: loop header
LB: loop body
LE: loop exit
PB: predicated region body
PF: predicated region fallthrough
CT: control target
= control target key end

     0   :  { %vm131_vm0 = vcmask 1041408   ;;  %s693_s0 = inlined_call_operand.vmem [shape: f32[64,128], index: 0, kind: input, shape index: {}]   ;;  %s694_s1 = inlined_call_operand.vmem [shape: f32[64,4], index: 1, kind: input, shape index: {}]   ;;  %s695_s2 = inlined_call_operand.vmem [shape: f32[64,4], index: 2, kind: input, shape index: {}]   ;;  %s696_s3 = inlined_call_operand.vmem [shape: bf16[4,128], index: 3, kind: input, shape index: {}]   ;;  %s697_s4 = inlined_call_operand.vmem [shape: f32[1,128], index: 4, kind: input, shape index: {}]   ;;  %s698_s5 = inlined_call_operand.vmem [shape: f32[1,128], index: 5, kind: input, shape index: {}]   ;;  %s699_s6 = inlined_call_operand.hbm [shape: f32[64,128], index: 6, kind: output, shape index: {}]  }
   0x1   :  { %v73_v0 = vld [vmem:[%s696_s3] sm:$0x3]  ;;  %v34_v3 = vld [vmem:[%s695_s2 + $0x8] sm:$0xff]  ;;  %v35_v10 = vld [vmem:[%s695_s2 + $0x10] sm:$0xff] }
   0x2   :  { %494 = vmatprep.subr.msk.bf16.mxu1 %vm131_vm0, %v73_v0  ;;  %493 = vmatprep.subr.msk.bf16.mxu0 %vm131_vm0, %v73_v0  ;;  %v582_v1 = vsel %vm131_vm0, %v73_v0, 0  ;;  %v33_v2 = vld [vmem:[%s695_s2] sm:$0xff]  ;;  %v50_v5 = vadd.f32 1.0, %v34_v3  ;;  %v38_v7 = vld [vmem:[%s695_s2 + $0x28] sm:$0xff]  ;;  %v36_v11 = vld [vmem:[%s695_s2 + $0x18] sm:$0xff]  ;;  %v51_v12 = vadd.f32 1.0, %v35_v10 }
   0x3   :  { %492 = vmatpush3.bf16.msra.mxu1 %v582_v1  ;;  %462 = vmatpush3.bf16.msra.mxu0 %v582_v1  ;;  %v49_v4 = vadd.f32 1.0, %v33_v2  ;;  %v37_v6 = vld [vmem:[%s695_s2 + $0x20] sm:$0xff]  ;;  %v54_v9 = vadd.f32 1.0, %v38_v7  ;;  %v52_v13 = vadd.f32 1.0, %v36_v11  ;;  %v39_v14 = vld [vmem:[%s695_s2 + $0x30] sm:$0xff]  ;;  %v40_v15 = vld [vmem:[%s695_s2 + $0x38] sm:$0xff] }
   0x4   :  { %v53_v8 = vadd.f32 1.0, %v37_v6  ;;  %495 = vmatprep.subr.msk.bf16.mxu1 %vm131_vm0, %v73_v0  ;;  %496 = vmatprep.subr.msk.bf16.mxu0 %vm131_vm0, %v73_v0 }
   0x5   :  { %500 = vrcp.f32 %v49_v4 }
   0x6   :  { %502 = vrcp.f32 %v50_v5 }
   0x7   :  { %11 = vsyncpa [#allocation3], 0  ;;  %504 = vrcp.f32 %v53_v8  ;;  %v55_v16 = vadd.f32 1.0, %v39_v14  ;;  %v56_v17 = vadd.f32 1.0, %v40_v15  ;;  %v25_v18 = vld [vmem:[%s694_s1] sm:$0xff]  ;;  %v26_v19 = vld [vmem:[%s694_s1 + $0x8] sm:$0xff] }
   0x8   :  { %506 = vrcp.f32 %v54_v9  ;;  %v29_v20 = vld [vmem:[%s694_s1 + $0x20] sm:$0xff]  ;;  %v41_v21 = vsub.f32 %v33_v2, %v25_v18  ;;  %v30_v22 = vld [vmem:[%s694_s1 + $0x28] sm:$0xff]  ;;  %v42_v23 = vsub.f32 %v34_v3, %v26_v19  ;;  %v27_v24 = vld [vmem:[%s694_s1 + $0x10] sm:$0xff]  ;;  %vm118_vm1 = vcmask 31744   ;;  %s538_s20 = smov [#allocation2]  }
   0x9   :  { %508 = vrcp.f32 %v51_v12  ;;  %v45_v25 = vsub.f32 %v37_v6, %v29_v20  ;;  %v28_v26 = vld [vmem:[%s694_s1 + $0x18] sm:$0xff]  ;;  %v46_v28 = vsub.f32 %v38_v7, %v30_v22  ;;  %v31_v29 = vld [vmem:[%s694_s1 + $0x30] sm:$0xff]  ;;  %v43_v32 = vsub.f32 %v35_v10, %v27_v24  ;;  %s421_s21 = sshll.u32 %s538_s20, 4  ;;  %s422_s21 = int_to_ptr.vmem [resolvable:$true] %s421_s21 }
   0xa   :  { %510 = vrcp.f32 %v52_v13  ;;  %v44_v35 = vsub.f32 %v36_v11, %v28_v26  ;;  %v32_v36 = vld [vmem:[%s694_s1 + $0x38] sm:$0xff]  ;;  %v47_v39 = vsub.f32 %v39_v14, %v31_v29  ;;  %s516_s22 = scalar_lea.vmem %s422_s21, 1024  ;;  %p521_p1 = scmp.lt.s32.totalorder %s422_s21, %s422_s21 }
   0xb   :  { %512 = vrcp.f32 %v55_v16  ;;  %v48_v45 = vsub.f32 %v40_v15, %v32_v36  ;;  %p517_p0 = scmp.ne.s32.totalorder %s422_s21, %s516_s22  ;;  %p522_p2 = scmp.lt.s32.totalorder %s516_s22, %s516_s22 }
   0xc   :  { %514 = vrcp.f32 %v56_v17 }
   0xd   :  { %p523_p3 = por %p522_p2, %p521_p1 }
   0xf   :  { %p524_p4 = pnand %p523_p3, %p517_p0 }
  0x12   :  { %v501_v27 = vpop.eup %500 }
  0x13   :  { %v503_v30 = vpop.eup %502  ;;  %v58_v31 = vmul.f32 %v501_v27, %v41_v21 }
  0x14   :  { %v505_v33 = vpop.eup %504  ;;  %v60_v34 = vmul.f32 %v503_v30, %v42_v23 }
  0x15   :  { %v507_v37 = vpop.eup %506  ;;  %v66_v38 = vmul.f32 %v505_v33, %v45_v25 }
  0x16   :  { %v509_v40 = vpop.eup %508  ;;  %v74_v41 = vpack.c.bf16 %v60_v34, %v58_v31  ;;  %v68_v42 = vmul.f32 %v507_v37, %v46_v28 }
  0x17   :  { %v511_v43 = vpop.eup %510  ;;  %v62_v44 = vmul.f32 %v509_v40, %v43_v32 }
  0x18   :  { %v513_v46 = vpop.eup %512  ;;  %v78_v47 = vunpack.c.l.bf16 %v74_v41  ;;  %v79_v48 = vunpack.c.h.bf16 %v74_v41  ;;  %v76_v49 = vpack.c.bf16 %v68_v42, %v66_v38  ;;  %v64_v50 = vmul.f32 %v511_v43, %v44_v35 }
  0x19   :  { %v515_v51 = vpop.eup %514  ;;  %v70_v52 = vmul.f32 %v513_v46, %v47_v39 }
  0x1a   :  { %v86_v53 = vsub.f32 %v58_v31, %v78_v47  ;;  %v87_v54 = vsub.f32 %v60_v34, %v79_v48  ;;  %v82_v55 = vunpack.c.l.bf16 %v76_v49  ;;  %v83_v56 = vunpack.c.h.bf16 %v76_v49  ;;  %v656_v47 = vld [vmem:[%s698_s5] ss:$0 sm:$0xff] }
  0x1b   :  { %v75_v57 = vpack.c.bf16 %v64_v50, %v62_v44  ;;  %v72_v58 = vmul.f32 %v515_v51, %v48_v45 }
  0x1c   :  { %v94_v59 = vpack.c.bf16 %v87_v54, %v86_v53  ;;  %v90_v60 = vsub.f32 %v66_v38, %v82_v55  ;;  %v91_v61 = vsub.f32 %v68_v42, %v83_v56  ;;  %v444_v42 = vld [vmem:[%s697_s4] ss:$0 sm:$0xff] }
  0x1d   :  { %v80_v62 = vunpack.c.l.bf16 %v75_v57  ;;  %v81_v63 = vunpack.c.h.bf16 %v75_v57  ;;  %v77_v0 = vpack.c.bf16 %v72_v58, %v70_v52 }
  0x1e   :  { %v98_v2 = vunpack.c.l.bf16 %v94_v59  ;;  %v99_v3 = vunpack.c.h.bf16 %v94_v59  ;;  %463 = vmatprep.mubr.msk.bf16.mxu0 %vm118_vm1, %v94_v59  ;;  %v96_v4 = vpack.c.bf16 %v91_v61, %v90_v60 }
  0x1f   :  { %v88_v5 = vsub.f32 %v62_v44, %v80_v62  ;;  %v89_v6 = vsub.f32 %v64_v50, %v81_v63  ;;  %v84_v7 = vunpack.c.l.bf16 %v77_v0  ;;  %v85_v8 = vunpack.c.h.bf16 %v77_v0 }
  0x20   :  { %v106_v9 = vsub.f32 %v86_v53, %v98_v2  ;;  %v107_v10 = vsub.f32 %v87_v54, %v99_v3  ;;  %v102_v11 = vunpack.c.l.bf16 %v96_v4  ;;  %v103_v12 = vunpack.c.h.bf16 %v96_v4  ;;  %467 = vmatprep.mubr.msk.bf16.mxu1 %vm118_vm1, %v96_v4  ;;  %v364_v53 = vld [vmem:[%s693_s0 + $0x10] sm:$0xff]  ;;  %v365_v4 = vld [vmem:[%s693_s0 + $0x18] sm:$0xff] }
  0x21   :  { %v95_v13 = vpack.c.bf16 %v89_v6, %v88_v5  ;;  %v92_v14 = vsub.f32 %v70_v52, %v84_v7  ;;  %v93_v15 = vsub.f32 %v72_v58, %v85_v8 }
  0x22   :  { %v114_v16 = vpack.c.bf16 %v107_v10, %v106_v9  ;;  %v110_v20 = vsub.f32 %v90_v60, %v102_v11  ;;  %v111_v21 = vsub.f32 %v91_v61, %v103_v12  ;;  %v362_v60 = vld [vmem:[%s693_s0] sm:$0xff]  ;;  %v363_v11 = vld [vmem:[%s693_s0 + $0x8] sm:$0xff] }
  0x23   :  { %v100_v17 = vunpack.c.l.bf16 %v95_v13  ;;  %v101_v18 = vunpack.c.h.bf16 %v95_v13  ;;  %464 = vmatmul.mubr.msk.bf16.vlgmr.msra.gmra.mxu0 %vm118_vm1, %v95_v13  ;;  %v97_v19 = vpack.c.bf16 %v93_v15, %v92_v14 }
  0x24   :  { %482 = vmatpush3.bf16.msra.mxu0 %v582_v1  ;;  %483 = vmatprep.mubr.msk.bf16.mxu0 %vm118_vm1, %v114_v16  ;;  %v116_v27 = vpack.c.bf16 %v111_v21, %v110_v20 }
  0x25   :  { %v108_v22 = vsub.f32 %v88_v5, %v100_v17  ;;  %v109_v23 = vsub.f32 %v89_v6, %v101_v18  ;;  %468 = vmatmul.mubr.msk.bf16.vlgmr.msra.gmra.mxu1 %vm118_vm1, %v97_v19  ;;  %v104_v25 = vunpack.c.l.bf16 %v97_v19  ;;  %v105_v26 = vunpack.c.h.bf16 %v97_v19 }
  0x26   :  { %472 = vmatpush3.bf16.msra.mxu1 %v582_v1  ;;  %473 = vmatprep.mubr.msk.bf16.mxu1 %vm118_vm1, %v74_v41 }
  0x27   :  { %v115_v24 = vpack.c.bf16 %v109_v23, %v108_v22  ;;  %v112_v28 = vsub.f32 %v92_v14, %v104_v25  ;;  %v113_v29 = vsub.f32 %v93_v15, %v105_v26  ;;  %v368_v22 = vld [vmem:[%s693_s0 + $0x30] sm:$0xff] }
  0x29   :  { %v117_v30 = vpack.c.bf16 %v113_v29, %v112_v28 }
  0x2b   :  { %484 = vmatmul.mubr.msk.bf16.vlgmr.msra.gmra.mxu0 %vm118_vm1, %v115_v24 }
  0x2c   :  { %487 = vmatprep.mubr.msk.bf16.mxu0 %vm118_vm1, %v116_v27  ;;  %v366_v27 = vld [vmem:[%s693_s0 + $0x20] sm:$0xff] }
  0x2d   :  { %474 = vmatmul.mubr.msk.bf16.vlgmr.msra.gmra.mxu1 %vm118_vm1, %v75_v57 }
  0x2e   :  { %477 = vmatprep.mubr.msk.bf16.mxu1 %vm118_vm1, %v76_v49 }
  0x33   :  { %488 = vmatmul.mubr.msk.bf16.gmra.mxu0 %vm118_vm1, %v117_v30 }
  0x35   :  { %478 = vmatmul.mubr.msk.bf16.gmra.mxu1 %vm118_vm1, %v77_v0 }
  0xe3   :  { %v465_v1 = vpop.f32.mrf.mxu0 }
  0xe5   :  { %v469_v31 = vpop.f32.mrf.mxu1  ;;  %v169_v32 = vpop.f32.mrf.mxu0 }
  0xe7   :  { %v185_v33 = vpop.f32.mrf.mxu1  ;;  %v466_v34 = vpop.f32.mrf.mxu0 }
  0xe9   :  { %v470_v35 = vpop.f32.mrf.mxu1  ;;  %v172_v36 = vpop.f32.mrf.mxu0 }
  0xeb   :  { %v188_v37 = vpop.f32.mrf.mxu1  ;;  %v485_v38 = vpop.f32.mrf.mxu0 }
  0xed   :  { %v475_v39 = vpop.f32.mrf.mxu1  ;;  %v323_v40 = vpop.f32.mrf.mxu0 }
  0xee   :  { %v255_v41 = vadd.f32 %v475_v39, %v465_v1 }
  0xef   :  { %v246_v43 = vpop.f32.mrf.mxu1  ;;  %v486_v44 = vpop.f32.mrf.mxu0 }
  0xf0   :  { %v356_v45 = vadd.f32 %v485_v38, %v255_v41  ;;  %v247_v46 = vadd.f32 %v246_v43, %v169_v32  ;;  %v369_v32 = vld [vmem:[%s693_s0 + $0x38] sm:$0xff] }
  0xf1   :  { %v476_v48 = vpop.f32.mrf.mxu1  ;;  %v326_v49 = vpop.f32.mrf.mxu0 }
  0xf2   :  { %v379_v50 = vmul.f32 %v444_v42, %v356_v45  ;;  %v354_v51 = vadd.f32 %v323_v40, %v247_v46  ;;  %v258_v52 = vadd.f32 %v476_v48, %v466_v34 }
  0xf3   :  { %v249_v54 = vpop.f32.mrf.mxu1  ;;  %v489_v55 = vpop.f32.mrf.mxu0 }
  0xf4   :  { %v394_v56 = vadd.f32 %v656_v47, %v379_v50  ;;  %v377_v57 = vmul.f32 %v444_v42, %v354_v51  ;;  %v357_v58 = vadd.f32 %v486_v44, %v258_v52  ;;  %v250_v59 = vadd.f32 %v249_v54, %v172_v36  ;;  %v367_v36 = vld [vmem:[%s693_s0 + $0x28] sm:$0xff] }
  0xf5   :  { %v479_v61 = vpop.f32.mrf.mxu1  ;;  %v339_v62 = vpop.f32.mrf.mxu0 }
  0xf6   :  { %v402_v63 = vmul.f32 %v394_v56, %v364_v53  ;;  %v392_v0 = vadd.f32 %v656_v47, %v377_v57  ;;  %v380_v2 = vmul.f32 %v444_v42, %v357_v58  ;;  %v355_v3 = vadd.f32 %v326_v49, %v250_v59 }
  0xf7   :  { %v271_v5 = vadd.f32 %v479_v61, %v469_v31  ;;  %v262_v6 = vpop.f32.mrf.mxu1  ;;  %v490_v14 = vpop.f32.mrf.mxu0 }
  0xf8   :  { %410 = vst [vmem:[#allocation2 + $0x10] sm:$0xff] %v402_v63  ;;  %v400_v7 = vmul.f32 %v392_v0, %v362_v60  ;;  %v395_v8 = vadd.f32 %v656_v47, %v380_v2  ;;  %v378_v9 = vmul.f32 %v444_v42, %v355_v3  ;;  %v263_v10 = vadd.f32 %v262_v6, %v185_v33 }
  0xf9   :  { %v360_v12 = vadd.f32 %v489_v55, %v271_v5  ;;  %v480_v13 = vpop.f32.mrf.mxu1  ;;  %v342_v28 = vpop.f32.mrf.mxu0 }
  0xfa   :  { %408 = vst [vmem:[#allocation2] sm:$0xff] %v400_v7  ;;  %v403_v15 = vmul.f32 %v395_v8, %v365_v4  ;;  %v393_v16 = vadd.f32 %v656_v47, %v378_v9  ;;  %v358_v17 = vadd.f32 %v339_v62, %v263_v10  ;;  %v274_v18 = vadd.f32 %v480_v13, %v470_v35 }
  0xfb   :  { %v383_v19 = vmul.f32 %v444_v42, %v360_v12  ;;  %v265_v20 = vpop.f32.mrf.mxu1 }
  0xfc   :  { %411 = vst [vmem:[#allocation2 + $0x18] sm:$0xff] %v403_v15  ;;  %v401_v21 = vmul.f32 %v393_v16, %v363_v11  ;;  %v381_v23 = vmul.f32 %v444_v42, %v358_v17  ;;  %v361_v24 = vadd.f32 %v490_v14, %v274_v18  ;;  %v266_v25 = vadd.f32 %v265_v20, %v188_v37 }
  0xfd   :  { %v398_v26 = vadd.f32 %v656_v47, %v383_v19 }
  0xfe   :  { %409 = vst [vmem:[#allocation2 + $0x8] sm:$0xff] %v401_v21  ;;  %v396_v29 = vadd.f32 %v656_v47, %v381_v23  ;;  %v384_v30 = vmul.f32 %v444_v42, %v361_v24  ;;  %v359_v1 = vadd.f32 %v342_v28, %v266_v25 }
  0xff   :  { %v406_v31 = vmul.f32 %v398_v26, %v368_v22 }
 0x100   :  { %v404_v33 = vmul.f32 %v396_v29, %v366_v27  ;;  %v399_v34 = vadd.f32 %v656_v47, %v384_v30  ;;  %v382_v35 = vmul.f32 %v444_v42, %v359_v1 }
 0x101   :  { %414 = vst [vmem:[#allocation2 + $0x30] sm:$0xff] %v406_v31 }
 0x102   :  { %412 = vst [vmem:[#allocation2 + $0x20] sm:$0xff] %v404_v33  ;;  %v407_v37 = vmul.f32 %v399_v34, %v369_v32  ;;  %v397_v38 = vadd.f32 %v656_v47, %v382_v35 }
 0x104   :  { %415 = vst [vmem:[#allocation2 + $0x38] sm:$0xff] %v407_v37  ;;  %v405_v39 = vmul.f32 %v397_v38, %v367_v36 }
 0x106   :  { %413 = vst [vmem:[#allocation2 + $0x28] sm:$0xff] %v405_v39 }
 0x107   :  { %527 = shalt.err (!%p524_p4)
}
 0x108   :  { %s539_s23 = smov 128   ;;  %s540_s24 = smov 8  }
 0x109   :  { %427 = dma.vmem_to_hbm [thread:$0]  %s422_s21, 1024, %s699_s6, [#allocation3], %s539_s23, %s539_s23, %s540_s24  }
 0x10a   :  { %536 = dma.done.wait [#allocation3], 1024  }
 0x10b   :  { %537 = vsyncadd [#allocation3], 4294966272 }
 0x10c   :  { %431 = vsyncpa [#allocation3], 1 }

</bundles_post_ra>
